<compile_context>
chip_gen: v7x
topology: tpu7x:2x2x1
jax: 0.10.0
libtpu: 0.0.40
codegen_flags: <defaults>
</compile_context>

<pallas_src>
import jax
import jax.numpy as jnp
from jax.experimental import pallas as pl
from jax.experimental.pallas import tpu as pltpu

B, D, C = 8, 32, 16  # batch, in_features, num_classes


# ---------------------------------------------------------------- fused kernel
def _fisher_penalty_kernel(x_ref, w_ref, b_ref, u_ref, trace_ref, y_ref):
    x = x_ref[...]                                                # [B, D] f32

    # ---- model forward: logits = x @ W + b   (MXU)
    logits = (
        jnp.dot(x, w_ref[...], preferred_element_type=jnp.float32)
        + b_ref[...]
    )                                                             # [B, C]

    # ---- softmax(y_pred, dim=1)  (exact divide: tightest numerical path)
    m = jnp.max(logits, axis=1, keepdims=True)
    e = jnp.exp(logits - m)
    p = e / jnp.sum(e, axis=1, keepdims=True)                     # [B, C]

    # ---- prob.multinomial(1) via inverse-CDF on wrapper-provided uniforms.
    # Cumulative sum over classes done as p @ upper-triangular matrix (MXU)
    # to avoid a lane-axis scan.
    r_cc = jax.lax.broadcasted_iota(jnp.int32, (C, C), 0)
    c_cc = jax.lax.broadcasted_iota(jnp.int32, (C, C), 1)
    tri = (r_cc <= c_cc).astype(jnp.float32)                      # [C, C]
    cs = jnp.dot(p, tri, preferred_element_type=jnp.float32)      # [B, C] cum-probs

    u = u_ref[...]                                                # [B, 1] in [0,1)
    ind = (cs <= u).astype(jnp.float32)                           # [B, C] monotone
    # sampled class = #{c : cs[b,c] <= u[b]}, clamped for fp edge cs[:,C-1]<u
    cnt = jnp.minimum(jnp.sum(ind, axis=1, keepdims=True),
                      float(C - 1))                               # [B, 1] f32 int-valued
    col = jax.lax.broadcasted_iota(jnp.int32, (B, C), 1).astype(jnp.float32)
    onehot = (col == cnt).astype(jnp.float32)                     # [B, C]

    # Emit labels lane-dense as (1, B): idx_row @ onehot^T via dot_general
    # (contract class axes) — no transpose relayout needed.
    idx_row = jax.lax.broadcasted_iota(jnp.int32, (1, C), 1).astype(jnp.float32)
    y_row = jax.lax.dot_general(idx_row, onehot, (((1,), (1,)), ((), ())),
                                preferred_element_type=jnp.float32)  # [1, B]
    y_ref[...] = (y_row + 0.5).astype(jnp.int32)

    # ---- analytic backward of mean-reduced cross-entropy w.r.t. logits
    g = (p - onehot) * (1.0 / B)                                  # [B, C]

    # ---- trace = sum(dW^2) + sum(db^2) via [B,B] Grams (dW never formed)
    #   sum(dW^2) = sum(xx * gg),  sum(db^2) = sum(gg)
    xx = jax.lax.dot_general(x, x, (((1,), (1,)), ((), ())),
                             preferred_element_type=jnp.float32)  # [B, B]
    gg = jax.lax.dot_general(g, g, (((1,), (1,)), ((), ())),
                             preferred_element_type=jnp.float32)  # [B, B]
    trace_ref[0] = jnp.sum((xx + 1.0) * gg)


def fisher_penalty(x, w, b, u):
    trace_out, y_out = pl.pallas_call(
        _fisher_penalty_kernel,
        out_shape=(
            jax.ShapeDtypeStruct((1,), jnp.float32),    # trace (1-D SMEM scalar)
            jax.ShapeDtypeStruct((1, B), jnp.int32),    # sampled labels, lane-dense
        ),
        in_specs=[
            pl.BlockSpec(memory_space=pltpu.MemorySpace.VMEM),  # x  [B, D]
            pl.BlockSpec(memory_space=pltpu.MemorySpace.VMEM),  # w  [D, C]
            pl.BlockSpec(memory_space=pltpu.MemorySpace.VMEM),  # b  [1, C]
            pl.BlockSpec(memory_space=pltpu.MemorySpace.VMEM),  # u  [B, 1]
        ],
        out_specs=(
            pl.BlockSpec(memory_space=pltpu.MemorySpace.SMEM),
            pl.BlockSpec(memory_space=pltpu.MemorySpace.VMEM),
        ),
    )(x, w, b, u)
    return trace_out[0], y_out[0]


# ------------------------------------------------------- pure-JAX reference
def reference_trace(x, w, b, y):
    def loss_fn(params):
        w_, b_ = params
        logits = x @ w_ + b_
        logp = jax.nn.log_softmax(logits, axis=1)
        return -jnp.mean(logp[jnp.arange(B), y])

    grads = jax.grad(loss_fn)((w, b))
    return sum(jnp.sum(g ** 2) for g in grads)


if __name__ == "__main__":
    key = jax.random.PRNGKey(0)
    kx, kw, kb, ku = jax.random.split(key, 4)
    x = jax.random.normal(kx, (B, D), jnp.float32)
    w = 0.1 * jax.random.normal(kw, (D, C), jnp.float32)
    b = 0.1 * jax.random.normal(kb, (1, C), jnp.float32)
    u = jax.random.uniform(ku, (B, 1), jnp.float32)   # one uniform per row

    trace, y = fisher_penalty(x, w, b, u)
    trace = jax.block_until_ready(trace)

    ref = reference_trace(x, w, b, y)
    assert jnp.allclose(trace, ref, rtol=2e-3, atol=1e-6), (trace, ref)
    print("KERNEL_OK")
</pallas_src>

<mosaic_0001>
module attributes {stable_mosaic.version = 11 : i64} {
  func.func @_fisher_penalty_kernel(%arg0: memref<8x32xf32, #tpu.memory_space<vmem>>, %arg1: memref<32x16xf32, #tpu.memory_space<vmem>>, %arg2: memref<1x16xf32, #tpu.memory_space<vmem>>, %arg3: memref<8x1xf32, #tpu.memory_space<vmem>>, %arg4: memref<1xf32, #tpu.memory_space<smem>>, %arg5: memref<1x8xi32, #tpu.memory_space<vmem>>) attributes {dimension_semantics = [], scalar_prefetch = 0 : i64, scratch_operands = 0 : i64, tpu.core_type = #tpu.core_type<tc>} {
    %c0 = arith.constant 0 : index
    %c0_0 = arith.constant 0 : index
    %0 = vector.load %arg0[%c0, %c0_0] : memref<8x32xf32, #tpu.memory_space<vmem>>, vector<8x32xf32>
    %c0_1 = arith.constant 0 : index
    %c0_2 = arith.constant 0 : index
    %1 = vector.load %arg1[%c0_1, %c0_2] : memref<32x16xf32, #tpu.memory_space<vmem>>, vector<32x16xf32>
    %cst = arith.constant dense<0.000000e+00> : vector<8x16xf32>
    %2 = tpu.matmul %0, %1, %cst {dimension_numbers = #tpu.dot_dimension_numbers<[1], [0], [0], [1], [0, 0, 1, 1], [], []>} : vector<8x32xf32>, vector<32x16xf32>, vector<8x16xf32> -> vector<8x16xf32>
    %c0_3 = arith.constant 0 : index
    %c0_4 = arith.constant 0 : index
    %3 = vector.load %arg2[%c0_3, %c0_4] : memref<1x16xf32, #tpu.memory_space<vmem>>, vector<1x16xf32>
    %4 = vector.broadcast %3 : vector<1x16xf32> to vector<8x16xf32>
    %5 = arith.addf %2, %4 : vector<8x16xf32>
    %cst_5 = arith.constant dense<0xFF800000> : vector<8xf32>
    %6 = vector.multi_reduction <maximumf>, %5, %cst_5 [1] : vector<8x16xf32> to vector<8xf32>
    %7 = vector.shape_cast %6 : vector<8xf32> to vector<8x1xf32>
    %8 = vector.broadcast %7 : vector<8x1xf32> to vector<8x16xf32>
    %9 = arith.subf %5, %8 : vector<8x16xf32>
    %10 = math.exp %9 : vector<8x16xf32>
    %cst_6 = arith.constant dense<0.000000e+00> : vector<8xf32>
    %11 = vector.multi_reduction <add>, %10, %cst_6 [1] : vector<8x16xf32> to vector<8xf32>
    %12 = vector.shape_cast %11 : vector<8xf32> to vector<8x1xf32>
    %13 = vector.broadcast %12 : vector<8x1xf32> to vector<8x16xf32>
    %14 = arith.divf %10, %13 : vector<8x16xf32>
    %15 = tpu.iota {dimensions = array<i32: 0>} : vector<16x16xi32>
    %16 = tpu.iota {dimensions = array<i32: 1>} : vector<16x16xi32>
    %17 = arith.cmpi sle, %15, %16 : vector<16x16xi32>
    %18 = arith.extui %17 : vector<16x16xi1> to vector<16x16xi32>
    %19 = arith.sitofp %18 : vector<16x16xi32> to vector<16x16xf32>
    %cst_7 = arith.constant dense<0.000000e+00> : vector<8x16xf32>
    %20 = tpu.matmul %14, %19, %cst_7 {dimension_numbers = #tpu.dot_dimension_numbers<[1], [0], [0], [1], [0, 0, 1, 1], [], []>} : vector<8x16xf32>, vector<16x16xf32>, vector<8x16xf32> -> vector<8x16xf32>
    %c0_8 = arith.constant 0 : index
    %c0_9 = arith.constant 0 : index
    %21 = vector.load %arg3[%c0_8, %c0_9] : memref<8x1xf32, #tpu.memory_space<vmem>>, vector<8x1xf32>
    %22 = vector.broadcast %21 : vector<8x1xf32> to vector<8x16xf32>
    %23 = arith.cmpf ole, %20, %22 : vector<8x16xf32>
    %24 = arith.extui %23 : vector<8x16xi1> to vector<8x16xi32>
    %25 = arith.sitofp %24 : vector<8x16xi32> to vector<8x16xf32>
    %cst_10 = arith.constant dense<0.000000e+00> : vector<8xf32>
    %26 = vector.multi_reduction <add>, %25, %cst_10 [1] : vector<8x16xf32> to vector<8xf32>
    %27 = vector.shape_cast %26 : vector<8xf32> to vector<8x1xf32>
    %cst_11 = arith.constant 1.500000e+01 : f32
    %28 = vector.broadcast %cst_11 : f32 to vector<8x1xf32>
    %29 = arith.minimumf %27, %28 : vector<8x1xf32>
    %30 = tpu.iota {dimensions = array<i32: 1>} : vector<8x16xi32>
    %31 = arith.sitofp %30 : vector<8x16xi32> to vector<8x16xf32>
    %32 = vector.broadcast %29 : vector<8x1xf32> to vector<8x16xf32>
    %33 = arith.cmpf oeq, %31, %32 : vector<8x16xf32>
    %34 = arith.extui %33 : vector<8x16xi1> to vector<8x16xi32>
    %35 = arith.sitofp %34 : vector<8x16xi32> to vector<8x16xf32>
    %36 = tpu.iota {dimensions = array<i32: 1>} : vector<1x16xi32>
    %37 = arith.sitofp %36 : vector<1x16xi32> to vector<1x16xf32>
    %cst_12 = arith.constant dense<0.000000e+00> : vector<1x8xf32>
    %38 = tpu.matmul %37, %35, %cst_12 {dimension_numbers = #tpu.dot_dimension_numbers<[1], [1], [0], [0], [0, 0, 1, 0], [], []>} : vector<1x16xf32>, vector<8x16xf32>, vector<1x8xf32> -> vector<1x8xf32>
    %cst_13 = arith.constant 5.000000e-01 : f32
    %39 = vector.broadcast %cst_13 : f32 to vector<1x8xf32>
    %40 = arith.addf %38, %39 : vector<1x8xf32>
    %41 = arith.fptosi %40 : vector<1x8xf32> to vector<1x8xi32>
    %c0_14 = arith.constant 0 : index
    %c0_15 = arith.constant 0 : index
    %42 = vector.load %arg5[%c0_14, %c0_15] : memref<1x8xi32, #tpu.memory_space<vmem>>, vector<1x8xi32>
    tpu.vector_store %arg5[%c0_14, %c0_15], %41 {strides = array<i32>} : memref<1x8xi32, #tpu.memory_space<vmem>>, vector<1x8xi32>,
    %43 = arith.subf %14, %35 : vector<8x16xf32>
    %cst_16 = arith.constant 1.250000e-01 : f32
    %44 = vector.broadcast %cst_16 : f32 to vector<8x16xf32>
    %45 = arith.mulf %43, %44 : vector<8x16xf32>
    %cst_17 = arith.constant dense<0.000000e+00> : vector<8x8xf32>
    %46 = tpu.matmul %0, %0, %cst_17 {dimension_numbers = #tpu.dot_dimension_numbers<[1], [1], [0], [0], [0, 0, 1, 0], [], []>} : vector<8x32xf32>, vector<8x32xf32>, vector<8x8xf32> -> vector<8x8xf32>
    %cst_18 = arith.constant dense<0.000000e+00> : vector<8x8xf32>
    %47 = tpu.matmul %45, %45, %cst_18 {dimension_numbers = #tpu.dot_dimension_numbers<[1], [1], [0], [0], [0, 0, 1, 0], [], []>} : vector<8x16xf32>, vector<8x16xf32>, vector<8x8xf32> -> vector<8x8xf32>
    %cst_19 = arith.constant 1.000000e+00 : f32
    %48 = vector.broadcast %cst_19 : f32 to vector<8x8xf32>
    %49 = arith.addf %46, %48 : vector<8x8xf32>
    %50 = arith.mulf %49, %47 : vector<8x8xf32>
    %51 = vector.shape_cast %50 : vector<8x8xf32> to vector<1x8x8xf32>
    %cst_20 = arith.constant dense<0.000000e+00> : vector<1xf32>
    %52 = vector.multi_reduction <add>, %51, %cst_20 [1, 2] : vector<1x8x8xf32> to vector<1xf32>
    %53 = vector.shape_cast %52 : vector<1xf32> to vector<1x1x1xf32>
    %54 = vector.extract %53[0, 0, 0] : f32 from vector<1x1x1xf32>
    %c0_21 = arith.constant 0 : index
    %55 = memref.load %arg4[%c0_21] : memref<1xf32, #tpu.memory_space<smem>>
    memref.store %54, %arg4[%c0_21] : memref<1xf32, #tpu.memory_space<smem>>
    return
  }
}

</mosaic_0001>

<bundles_post_ra>
// kernel: tpu_custom_call.1
= control target key start
LH: loop header
LB: loop body
LE: loop exit
PB: predicated region body
PF: predicated region fallthrough
CT: control target
= control target key end

     0   :  { %11 = vsyncpa [#allocation4], 0  ;;  %v609_v3 = vmov 0.0|0.0   ;;  %vm610_vm0 = vmmov 0   ;;  %v611_v6 = vmov 0.0   ;;  %s717_s0 = inlined_call_operand.vmem [shape: f32[8,32], index: 0, kind: input, shape index: {}]   ;;  %s718_s1 = inlined_call_operand.vmem [shape: f32[32,16], index: 1, kind: input, shape index: {}]   ;;  %s719_s2 = inlined_call_operand.vmem [shape: f32[1,16], index: 2, kind: input, shape index: {}]   ;;  %s720_s3 = inlined_call_operand.vmem [shape: f32[8,1], index: 3, kind: input, shape index: {}]   ;;  %s721_s4 = inlined_call_operand.hbm [shape: f32[1], index: 4, kind: output, shape index: {0}]   ;;  %s722_s5 = inlined_call_operand.hbm [shape: s32[1,8], index: 5, kind: output, shape index: {1}]  }
   0x1   :  { %v22_v0 = vld [vmem:[%s718_s1] sm:$0xff]  ;;  %v23_v1 = vld [vmem:[%s718_s1 + $0x8] sm:$0xff]  ;;  %v24_v2 = vld [vmem:[%s718_s1 + $0x10] sm:$0xff]  ;;  %547 = vmatprep.subr.bf16.mxu0 %v609_v3  ;;  %522 = vmatprep.mubr.msk.f32.mxu0 %vm610_vm0, %v611_v6 }
   0x2   :  { %v548_v4 = vpack.c.bf16 %v23_v1, %v22_v0  ;;  %v25_v5 = vld [vmem:[%s718_s1 + $0x18] sm:$0xff]  ;;  %553 = vmatprep.subr.bf16.mxu1 %v609_v3  ;;  %529 = vmatprep.mubr.msk.f32.mxu1 %vm610_vm0, %v611_v6 }
   0x3   :  { %12 = vsyncpa [#allocation3], 0  ;;  %v551_v7 = vpack.c.bf16 %v25_v5, %v24_v2  ;;  %v21_v8 = vld [vmem:[%s717_s0] sm:$0xff]  ;;  %vm33_vm1 = vcmask 261120   ;;  %vm107_vm2 = vcmask 130048   ;;  %v119_v19 = vlaneseq }
   0x4   :  { %549 = vmatpush3.bf16.msra.mxu0 %v548_v4  ;;  %v485_v9 = vld [vmem:[%s719_s2] ss:$0 sm:$0xff]  ;;  %v612_v23 = vmov 1.0|1.0   ;;  %v613_v25 = vmov 0   ;;  %vm297_vm8 = vcmask 57344  }
   0x5   :  { %550 = vmatprep.subr.bf16.mxu0 %v609_v3  ;;  %v120_v20 = vshrl.u32 %v119_v19, 7  ;;  %v123_v21 = vand.u32 127, %v119_v19  ;;  %v203_v24 = vld [vmem:[%s720_s3] sm:$0xff]  ;;  %567 = vset.pattern.permute.xlu1 %v613_v25  ;;  %vm445_vm9 = vcmask 64512   ;;  %s614_s3 = smov [#allocation5]  }
   0x6   :  { %568 = vset.pattern.permute.xlu0 %v613_v25  ;;  %206 = vperm.xlu1 %567, %v203_v24   ;;  %s472_s29 = sshll.u32 %s614_s3, 4  ;;  %s473_s29 = int_to_ptr.vmem [resolvable:$true] %s472_s29 }
   0x7   :  { %v121_v22 = vadd.s32 8, %v120_v20  ;;  %vm124_vm3 = vcmp.le.s32.totalorder %v120_v20, %v123_v21  ;;  %v216_v34 = vcvt.s32.f32 %v123_v21  ;;  %s573_s30 = scalar_lea.vmem %s473_s29, 16  ;;  %s577_s6 = scalar_lea.vmem %s473_s29, 32 }
   0x8   :  { %552 = vmatpush3.bf16.msra.mxu0 %v551_v7  ;;  %p574_p0 = scmp.ne.s32.totalorder %s473_s29, %s573_s30  ;;  %p578_p1 = scmp.lt.s32.totalorder %s473_s29, %s473_s29 }
   0x9   :  { %537 = vmatprep.subr.mxu0 %v611_v6  ;;  %vm125_vm4 = vcmp.le.s32.totalorder %v121_v22, %v123_v21  ;;  %p579_p2 = scmp.lt.s32.totalorder %s577_s6, %s573_s30 }
   0xa   :  { %vm554_vm5 = vmpackc.low %vm125_vm4, %vm124_vm3 }
   0xb   :  { %523 = vmatmul.mubr.msk.f32.vlgmr.msra.gmra.mrb[0].mxu0 %vm33_vm1, %v21_v8  ;;  %555 = vmatpush3.bf16.msk.msra.mxu1 %vm554_vm5, %v612_v23  ;;  %p580_p3 = por %p579_p2, %p578_p1 }
   0xc   :  { %539 = vmatprep.mubr.msk.f32.mxu0 %vm610_vm0, %v611_v6  ;;  %532 = vmatprep.subr.mxu1 %v611_v6 }
   0xd   :  { %p581_p4 = pnand %p580_p3, %p574_p0 }
  0x85   :  { %v207_v29 = vpop.permute.xlu1 %206 }
  0xde   :  { %v103_v10 = vpop.f32.mrb[0].mxu0 }
  0xdf   :  { %v104_v11 = vadd.f32 %v485_v9, %v103_v10  ;;  %v524_v12 = vpop.f32.mrb[1].mxu0 }
  0xe1   :  { %v108_v13 = vsel %vm107_vm2, %v104_v11, -inf }
  0xe2   :  { %109 = vmax.xlane.f32.xlu0 %v108_v13 }
 0x16f   :  { %v110_v14 = vpop.xlane.xlu0 %109 }
 0x170   :  { %v111_v15 = vsub.f32 %v104_v11, %v110_v14 }
 0x172   :  { %v112_v16 = vmul.f32 1.442695, %v111_v15 }
 0x174   :  { %569 = vpow2.f32 %v112_v16 }
 0x17e   :  { %v570_v17 = vpop.eup %569 }
 0x17f   :  { %v114_v18 = vsel %vm107_vm2, %v570_v17, 0.0 }
 0x180   :  { %115 = vadd.xlane.f32.xlu0 %v114_v18 }
 0x20d   :  { %v116_v26 = vpop.xlane.xlu0 %115 }
 0x20e   :  { %571 = vrcp.f32 %v116_v26 }
 0x218   :  { %v572_v27 = vpop.eup %571 }
 0x219   :  { %v118_v28 = vmul.f32 %v572_v27, %v570_v17 }
 0x21b   :  { %530 = vmatmul.mubr.msk.f32.vlgmr.msra.gmra.mrb[0].mxu1 %vm107_vm2, %v118_v28 }
 0x21c   :  { %534 = vmatprep.mubr.msk.f32.mxu1 %vm610_vm0, %v611_v6 }
 0x2ee   :  { %v199_v30 = vpop.f32.mrb[0].mxu1 }
 0x2ef   :  { %vm209_vm6 = vcmp.le.f32.partialorder %v199_v30, %v207_v29  ;;  %v531_v31 = vpop.f32.mrb[1].mxu1 }
 0x2f0   :  { %v492_v32 = vsel %vm209_vm6, 1.0, %v611_v6 }
 0x2f1   :  { %v212_v33 = vsel %vm107_vm2, %v492_v32, 0.0 }
 0x2f2   :  { %213 = vadd.xlane.f32.xlu1 %v212_v33 }
 0x37f   :  { %v214_v35 = vpop.xlane.xlu1 %213 }
 0x380   :  { %v215_v36 = vmin.f32 %v214_v35, 15.0 }
 0x382   :  { %vm217_vm7 = vcmp.eq.f32.partialorder %v216_v34, %v215_v36 }
 0x383   :  { %v493_v37 = vsel %vm217_vm7, 1.0, %v611_v6 }
 0x384   :  { %v299_v38 = vsub.f32 %v118_v28, %v493_v37  ;;  %533 = vmatpush3.xpose.msk.msra.mxu1 %vm107_vm2, %v493_v37 }
 0x385   :  { %542 = vmatprep.subr.mxu1 %v611_v6 }
 0x386   :  { %v300_v39 = vmul.f32 0.125, %v299_v38 }
 0x387   :  { %535 = vmatmul.mubr.msk.f32.vlgmr.msra.gmra.mrb[2].mxu1 %vm107_vm2, %v216_v34 }
 0x388   :  { %538 = vmatpush3.xpose.msk.msra.mxu0 %vm107_vm2, %v300_v39  ;;  %543 = vmatpush3.xpose.msk.msra.mxu1 %vm33_vm1, %v21_v8 }
 0x389   :  { %544 = vmatprep.mubr.msk.f32.mxu1 %vm610_vm0, %v611_v6 }
 0x38b   :  { %540 = vmatmul.mubr.msk.f32.vlgmr.msra.gmra.mrb[2].mxu0 %vm107_vm2, %v300_v39  ;;  %545 = vmatmul.mubr.msk.f32.vlgmr.msra.gmra.mrb[4].mxu1 %vm33_vm1, %v21_v8 }
 0x45a   :  { %v292_v40 = vpop.f32.mrb[2].mxu1 }
 0x45b   :  { %v293_v41 = vadd.f32 0.5, %v292_v40  ;;  %v536_v42 = vpop.f32.mrb[3].mxu1 }
 0x45d   :  { %v556_v43 = vtrunc.f32 %v293_v41 }
 0x45e   :  { %v370_v44 = vpop.f32.mrb[2].mxu0  ;;  %v440_v45 = vpop.f32.mrb[4].mxu1 }
 0x45f   :  { %v557_v46 = vcvt.f32.s32 %v556_v43  ;;  %v441_v47 = vadd.f32 1.0, %v440_v45  ;;  %v541_v48 = vpop.f32.mrb[3].mxu0  ;;  %v546_v49 = vpop.f32.mrb[5].mxu1 }
 0x461   :  { %v444_v50 = vmul.f32 %v441_v47, %v370_v44  ;;  %298 = vst.msk [vmem:[#allocation5] sm:$0x1] %vm297_vm8, %v557_v46 }
 0x463   :  { %v446_v51 = vsel %vm445_vm9, %v444_v50, 0.0 }
 0x464   :  { %447 = vadd.xlane.f32.xlu0 %v446_v51 }
 0x465   :  { %584 = shalt.err (!%p581_p4)
}
 0x466   :  { %s585_s9 = scalar_lea.hbm %s722_s5, 16 }
 0x467   :  { %p586_p5 = scmp.ne.s32.totalorder %s722_s5, %s585_s9  ;;  %p589_p6 = scmp.lt.u32.totalorder %s585_s9, %s722_s5 }
 0x469   :  { %p591_p7 = pnand %p589_p6, %p586_p5 }
 0x46b   :  { %594 = shalt.err (!%p591_p7)
}
 0x46c   :  { %475 = dma.vmem_to_hbm [thread:$0]  %s473_s29, 16, %s722_s5, [#allocation3]  }
 0x46d   :  { %s595_s19 = scalar_lea.hbm %s721_s4, 16 }
 0x46e   :  { %p596_p8 = scmp.ne.s32.totalorder %s721_s4, %s595_s19  ;;  %p599_p9 = scmp.lt.u32.totalorder %s595_s19, %s721_s4 }
 0x470   :  { %p601_p10 = pnand %p599_p9, %p596_p8 }
 0x4f1   :  { %v448_v52 = vpop.xlane.xlu0 %447 }
 0x4f2   :  { %v449_v53 = vrot.slane %v448_v52, 4 }
 0x4f4   :  { %v450_v54 = vadd.f32 %v449_v53, %v448_v52 }
 0x4f6   :  { %v451_v55 = vrot.slane %v450_v54, 2 }
 0x4f8   :  { %v452_v56 = vadd.f32 %v451_v55, %v450_v54 }
 0x4fa   :  { %v453_v57 = vrot.slane %v452_v56, 1 }
 0x4fc   :  { %v454_v58 = vadd.f32 %v453_v57, %v452_v56 }
 0x4fe   :  { %558 = vpush %v454_v58 }
 0x52f   :  { %s559_s16 = spop %558 }
 0x530   :  { %457 = sst [smem:[#allocation2]] %s559_s16 }
 0x531   :  { %604 = shalt.err (!%p601_p10)
}
 0x532   :  { %s615_s23 = smov [#allocation2]  }
 0x533   :  { %465 = dma.smem_to_hbm %s615_s23, 16, %s721_s4, [#allocation4]  }
 0x534   :  { %605 = dma.done.wait [#allocation4], 16  }
 0x535   :  { %606 = vsyncadd [#allocation4], 4294967280 }
 0x536   :  { %607 = dma.done.wait [#allocation3], 16  }
 0x537   :  { %608 = vsyncadd [#allocation3], 4294967280 }
 0x538   :  { %482 = sfence }
 0x539   :  { %483 = vsyncpa [#allocation3], 1 }
 0x53a   :  { %484 = vsyncpa [#allocation4], 1 }

</bundles_post_ra>
